<compile_context>
chip_gen: v6e
topology: v6e:2x2x1
jax: 0.10.0
libtpu: 0.0.40
codegen_flags: <defaults>
</compile_context>

<pallas_src>
import functools
import math

import jax
import jax.numpy as jnp
from jax import lax
from jax.experimental import pallas as pl
from jax.experimental.pallas import tpu as pltpu


def _flash_sdpa_kernel(q_ref, k_ref, v_ref, o_ref, qs_sc, m_sc, l_sc, acc_sc,
                       *, scale, kv_valid, exp_dtype, approx_recip):
    """One (batch, head, q-tile) group; KV tiles stream along the last grid axis.

    q_ref: (tq, D)   k_ref: (D, tk) (pre-transposed)   v_ref: (tk, D)
    """
    kv_idx = pl.program_id(3)

    @pl.when(kv_idx == 0)
    def _init():
        # Hoisted q scale: the q block is resident across the whole kv axis,
        # so scale it once per q tile instead of once per kv step.
        qs_sc[...] = q_ref[...] * scale
        m_sc[...] = jnp.full_like(m_sc, -jnp.inf)
        l_sc[...] = jnp.zeros_like(l_sc)
        acc_sc[...] = jnp.zeros_like(acc_sc)

    # QK^T: K arrives pre-transposed as (D, tk), so this is a plain MXU matmul
    # with no in-kernel transpose; f32 accumulation via preferred_element_type.
    s = jnp.dot(qs_sc[...], k_ref[...], preferred_element_type=jnp.float32)

    if kv_valid is not None:  # static: only when the KV axis was padded
        tk = k_ref.shape[-1]
        col = kv_idx * tk + lax.broadcasted_iota(jnp.int32, s.shape, 1)
        s = jnp.where(col < kv_valid, s, -jnp.inf)

    # Online (unnormalized) softmax update.
    m_prev = m_sc[...]
    m_new = jnp.maximum(m_prev, jnp.max(s, axis=-1, keepdims=True))
    alpha = jnp.exp(m_prev - m_new)

    if exp_dtype is not None:
        # bf16 exp path (v6e/v7x EUP has a bf16 path; halves EUP occupancy).
        # Row-sum and accumulator updates stay in f32.
        p = jnp.exp((s - m_new).astype(exp_dtype))
        p_sum = jnp.sum(p.astype(jnp.float32), axis=-1, keepdims=True)
    else:
        p = jnp.exp(s - m_new)
        p_sum = jnp.sum(p, axis=-1, keepdims=True)

    l_sc[...] = alpha * l_sc[...] + p_sum
    acc_sc[...] = alpha * acc_sc[...] + jnp.dot(
        p.astype(v_ref.dtype), v_ref[...], preferred_element_type=jnp.float32
    )
    m_sc[...] = m_new

    # Deferred normalization: one reciprocal + tq*D mults; cast to the output
    # dtype only at the final store.
    @pl.when(kv_idx == pl.num_programs(3) - 1)
    def _finalize():
        inv_l = pl.reciprocal(l_sc[...], approx=approx_recip)
        o_ref[...] = (acc_sc[...] * inv_l).astype(o_ref.dtype)


def _round_up(x, m):
    return ((x + m - 1) // m) * m


def _vmem_capacity_bytes():
    try:
        info = pltpu.get_tpu_info()
        cap = getattr(info, "vmem_capacity_bytes", None)
        if cap:
            return int(cap)
    except Exception:
        pass
    return 128 * 1024 * 1024  # v5e/v6e default


def scaled_dot_product_attention(q, k, v, *, tq=None, tk=None, bf16_exp=None):
    """softmax(q @ k^T / sqrt(D)) @ v for (B, H, S, D) inputs. Equivalent to
    torch.nn.functional.scaled_dot_product_attention with default arguments."""
    B, H, Sq, D = q.shape
    _, _, Skv, _ = k.shape

    vmem_cap = _vmem_capacity_bytes()
    small_vmem = vmem_cap <= 64 * 1024 * 1024  # v7x-class (64 MiB physical)

    # Generation-aware defaults: larger tq cuts KV HBM re-reads (the dominant
    # traffic at D<=64); v7x gets a smaller tq because its VMEM is half-size.
    desired_tq = tq if tq is not None else (512 if small_vmem else 1024)
    desired_tk = tk if tk is not None else 512

    # q tile: multiple of 8 (sublane rule), or the whole (8-padded) sequence.
    if desired_tq >= Sq:
        tq_ = max(8, _round_up(Sq, 8))
    else:
        tq_ = _round_up(desired_tq, 8)
    # kv tile: when it does not cover the whole sequence it sits on the lane
    # axis of the transposed K block, so it must be a multiple of 128.
    if desired_tk >= Skv:
        tk_ = max(8, _round_up(Skv, 8))
    else:
        tk_ = _round_up(desired_tk, 128)
        if tk_ >= Skv:
            tk_ = max(8, _round_up(Skv, 8))

    Sq_pad = _round_up(Sq, tq_)
    Skv_pad = _round_up(Skv, tk_)
    n_q = Sq_pad // tq_
    n_kv = Skv_pad // tk_

    # Pad awkward sequence lengths instead of falling back to full-S tiles.
    q_p = q
    if Sq_pad != Sq:
        q_p = jnp.pad(q, ((0, 0), (0, 0), (0, Sq_pad - Sq), (0, 0)))
    # Pre-transpose K once in the wrapper (amortized over all q tiles) so the
    # kernel's QK^T needs no per-step XLU transpose.
    kt = jnp.swapaxes(k, 2, 3)  # (B, H, D, Skv)
    v_p = v
    if Skv_pad != Skv:
        kt = jnp.pad(kt, ((0, 0), (0, 0), (0, 0), (0, Skv_pad - Skv)))
        v_p = jnp.pad(v, ((0, 0), (0, 0), (0, Skv_pad - Skv), (0, 0)))
    kv_valid = Skv if Skv_pad != Skv else None

    q_spec = pl.BlockSpec(
        (pl.Squeezed(), pl.Squeezed(), tq_, D), lambda b, h, qi, ki: (b, h, qi, 0)
    )
    k_spec = pl.BlockSpec(
        (pl.Squeezed(), pl.Squeezed(), D, tk_), lambda b, h, qi, ki: (b, h, 0, ki)
    )
    v_spec = pl.BlockSpec(
        (pl.Squeezed(), pl.Squeezed(), tk_, D), lambda b, h, qi, ki: (b, h, ki, 0)
    )
    # Output block does not depend on the kv axis -> stays resident across the
    # whole reduction and is stored exactly once (at kv == last).
    o_spec = pl.BlockSpec(
        (pl.Squeezed(), pl.Squeezed(), tq_, D), lambda b, h, qi, ki: (b, h, qi, 0)
    )
    # TODO(synk): for head_dim < 128 the output store is lane-masked; making it
    # lane-dense would require a (B, S, H*D) output layout + wrapper transpose,
    # which changes the module's (B, H, S, D) contract, so it is not done here.

    itemsize = jnp.dtype(q.dtype).itemsize
    vmem_est = (
        2 * tq_ * D * itemsize        # q tile, double-buffered
        + 4 * tk_ * D * itemsize      # k + v tiles, double-buffered
        + 2 * tq_ * D * itemsize      # output tile, double-buffered
        + tq_ * D * itemsize          # scaled-q scratch
        + 2 * tq_ * tk_ * 4           # f32 score tile + exp output live together
        + tq_ * tk_ * itemsize        # probabilities cast to the PV operand dtype
        + tq_ * D * 4                 # f32 running accumulator
        + 4 * tq_ * 4                 # m / l stats + small temporaries
    )
    # Scoped-VMEM ceiling: leave headroom under v7x's 64 MiB physical VMEM,
    # but allow large tiles / deeper buffering on 128 MiB chips.
    vmem_ceiling = (56 if small_vmem else 104) * 1024 * 1024
    vmem_limit = int(min(vmem_ceiling, max(32 * 1024 * 1024, 2 * vmem_est)))

    if bf16_exp is None:
        # bf16 EUP path only pays off (and only keeps accuracy acceptable) when
        # the inputs/outputs are already bf16; v5e has no bf16 EUP but the
        # legalized path is still correct there.
        bf16_exp = q.dtype == jnp.bfloat16
    exp_dtype = jnp.bfloat16 if bf16_exp else None
    approx_recip = q.dtype != jnp.float32  # exact reciprocal for f32 outputs

    kernel = functools.partial(
        _flash_sdpa_kernel,
        scale=float(1.0 / math.sqrt(D)),
        kv_valid=kv_valid,
        exp_dtype=exp_dtype,
        approx_recip=approx_recip,
    )

    out = pl.pallas_call(
        kernel,
        out_shape=jax.ShapeDtypeStruct((B, H, Sq_pad, D), q.dtype),
        grid_spec=pltpu.PrefetchScalarGridSpec(
            num_scalar_prefetch=0,
            grid=(B, H, n_q, n_kv),
            in_specs=[q_spec, k_spec, v_spec],
            out_specs=o_spec,
            scratch_shapes=[
                pltpu.VMEM((tq_, D), q.dtype),      # scaled q (written at kv==0)
                pltpu.VMEM((tq_, 1), jnp.float32),  # running max
                pltpu.VMEM((tq_, 1), jnp.float32),  # running denominator
                pltpu.VMEM((tq_, D), jnp.float32),  # running unnormalized output
            ],
        ),
        compiler_params=pltpu.CompilerParams(
            dimension_semantics=("parallel", "parallel", "parallel", "arbitrary"),
            vmem_limit_bytes=vmem_limit,
        ),
    )(q_p, kt, v_p)

    if Sq_pad != Sq:
        out = out[:, :, :Sq, :]
    return out


def _reference_sdpa(q, k, v):
    d = q.shape[-1]
    s = jnp.einsum("bhqd,bhkd->bhqk", q, k).astype(jnp.float32) / math.sqrt(d)
    p = jax.nn.softmax(s, axis=-1)
    return jnp.einsum("bhqk,bhkd->bhqd", p.astype(v.dtype), v)


if __name__ == "__main__":
    # Small shapes matching SDPA's (batch, heads, seq, head_dim) signature.
    B, H, S, D = 2, 4, 8, 32
    key = jax.random.PRNGKey(0)
    kq, kk, kv_ = jax.random.split(key, 3)
    q = jax.random.normal(kq, (B, H, S, D), dtype=jnp.float32)
    k = jax.random.normal(kk, (B, H, S, D), dtype=jnp.float32)
    v = jax.random.normal(kv_, (B, H, S, D), dtype=jnp.float32)

    out = jax.block_until_ready(scaled_dot_product_attention(q, k, v))
    ref = _reference_sdpa(q, k, v)
    assert out.shape == (B, H, S, D)
    assert jnp.allclose(out, ref, atol=2e-3, rtol=2e-3), float(
        jnp.max(jnp.abs(out - ref))
    )

    # Second check: bf16 inputs at a shape that exercises multiple q tiles and
    # multiple kv tiles (online-softmax accumulation across the reduction axis),
    # plus the bf16 EUP exp path.
    B2, H2, S2, D2 = 1, 2, 256, 64
    kq2, kk2, kv2 = jax.random.split(jax.random.PRNGKey(1), 3)
    q2 = jax.random.normal(kq2, (B2, H2, S2, D2), dtype=jnp.bfloat16)
    k2 = jax.random.normal(kk2, (B2, H2, S2, D2), dtype=jnp.bfloat16)
    v2 = jax.random.normal(kv2, (B2, H2, S2, D2), dtype=jnp.bfloat16)
    out2 = jax.block_until_ready(
        scaled_dot_product_attention(q2, k2, v2, tq=128, tk=128)
    )
    ref2 = _reference_sdpa(
        q2.astype(jnp.float32), k2.astype(jnp.float32), v2.astype(jnp.float32)
    )
    assert jnp.allclose(out2.astype(jnp.float32), ref2, atol=5e-2, rtol=5e-2), float(
        jnp.max(jnp.abs(out2.astype(jnp.float32) - ref2))
    )

    # Third check: ragged sequence length exercising the padding + key-masking
    # path (Skv not a multiple of the kv tile).
    B3, H3, S3, D3 = 1, 1, 200, 64
    kq3, kk3, kv3 = jax.random.split(jax.random.PRNGKey(2), 3)
    q3 = jax.random.normal(kq3, (B3, H3, S3, D3), dtype=jnp.float32)
    k3 = jax.random.normal(kk3, (B3, H3, S3, D3), dtype=jnp.float32)
    v3 = jax.random.normal(kv3, (B3, H3, S3, D3), dtype=jnp.float32)
    out3 = jax.block_until_ready(
        scaled_dot_product_attention(q3, k3, v3, tq=128, tk=128)
    )
    ref3 = _reference_sdpa(q3, k3, v3)
    assert out3.shape == (B3, H3, S3, D3)
    assert jnp.allclose(out3, ref3, atol=2e-3, rtol=2e-3), float(
        jnp.max(jnp.abs(out3 - ref3))
    )

    print("KERNEL_OK")
</pallas_src>

<mosaic_0001>
module attributes {stable_mosaic.version = 11 : i64} {
  func.func @_flash_sdpa_kernel(%arg0: i32, %arg1: i32, %arg2: i32, %arg3: i32, %arg4: memref<1x1x8x32xf32, #tpu.memory_space<vmem>>, %arg5: memref<1x1x32x8xf32, #tpu.memory_space<vmem>>, %arg6: memref<1x1x8x32xf32, #tpu.memory_space<vmem>>, %arg7: memref<1x1x8x32xf32, #tpu.memory_space<vmem>>, %arg8: memref<8x32xf32, #tpu.memory_space<vmem>>, %arg9: memref<8x1xf32, #tpu.memory_space<vmem>>, %arg10: memref<8x1xf32, #tpu.memory_space<vmem>>, %arg11: memref<8x32xf32, #tpu.memory_space<vmem>>) attributes {dimension_semantics = [#tpu.dimension_semantics<parallel>, #tpu.dimension_semantics<parallel>, #tpu.dimension_semantics<parallel>, #tpu.dimension_semantics<arbitrary>], iteration_bounds = array<i64: 2, 4, 1, 1>, scalar_prefetch = 0 : i64, scratch_operands = 4 : i64, tpu.core_type = #tpu.core_type<tc>, window_params = [{transform_indices = @transform_0, window_bounds = array<i64: 1, 1, 8, 32>}, {transform_indices = @transform_1, window_bounds = array<i64: 1, 1, 32, 8>}, {transform_indices = @transform_2, window_bounds = array<i64: 1, 1, 8, 32>}, {transform_indices = @transform_3, window_bounds = array<i64: 1, 1, 8, 32>}]} {
    %c0_i32 = arith.constant 0 : i32
    %0 = arith.cmpi eq, %arg3, %c0_i32 : i32
    %1 = arith.extui %0 : i1 to i32
    %c0_i32_0 = arith.constant 0 : i32
    %2 = arith.cmpi ne, %1, %c0_i32_0 : i32
    scf.if %2 {
      %c0_27 = arith.constant 0 : index
      %c0_28 = arith.constant 0 : index
      %c0_29 = arith.constant 0 : index
      %c0_30 = arith.constant 0 : index
      %34 = vector.load %arg4[%c0_27, %c0_28, %c0_29, %c0_30] : memref<1x1x8x32xf32, #tpu.memory_space<vmem>>, vector<1x1x8x32xf32>
      %35 = vector.shape_cast %34 : vector<1x1x8x32xf32> to vector<8x32xf32>
      %cst_31 = arith.constant 0.176776692 : f32
      %36 = vector.broadcast %cst_31 : f32 to vector<8x32xf32>
      %37 = arith.mulf %35, %36 : vector<8x32xf32>
      %c0_32 = arith.constant 0 : index
      %c0_33 = arith.constant 0 : index
      %38 = vector.load %arg8[%c0_32, %c0_33] : memref<8x32xf32, #tpu.memory_space<vmem>>, vector<8x32xf32>
      tpu.vector_store %arg8[%c0_32, %c0_33], %37 {strides = array<i32>} : memref<8x32xf32, #tpu.memory_space<vmem>>, vector<8x32xf32>,
      %cst_34 = arith.constant 0xFF800000 : f32
      %39 = vector.broadcast %cst_34 : f32 to vector<8x1xf32>
      %c0_35 = arith.constant 0 : index
      %c0_36 = arith.constant 0 : index
      %40 = vector.load %arg9[%c0_35, %c0_36] : memref<8x1xf32, #tpu.memory_space<vmem>>, vector<8x1xf32>
      tpu.vector_store %arg9[%c0_35, %c0_36], %39 {strides = array<i32>} : memref<8x1xf32, #tpu.memory_space<vmem>>, vector<8x1xf32>,
      %cst_37 = arith.constant 0.000000e+00 : f32
      %41 = vector.broadcast %cst_37 : f32 to vector<8x1xf32>
      %c0_38 = arith.constant 0 : index
      %c0_39 = arith.constant 0 : index
      %42 = vector.load %arg10[%c0_38, %c0_39] : memref<8x1xf32, #tpu.memory_space<vmem>>, vector<8x1xf32>
      tpu.vector_store %arg10[%c0_38, %c0_39], %41 {strides = array<i32>} : memref<8x1xf32, #tpu.memory_space<vmem>>, vector<8x1xf32>,
      %cst_40 = arith.constant 0.000000e+00 : f32
      %43 = vector.broadcast %cst_40 : f32 to vector<8x32xf32>
      %c0_41 = arith.constant 0 : index
      %c0_42 = arith.constant 0 : index
      %44 = vector.load %arg11[%c0_41, %c0_42] : memref<8x32xf32, #tpu.memory_space<vmem>>, vector<8x32xf32>
      tpu.vector_store %arg11[%c0_41, %c0_42], %43 {strides = array<i32>} : memref<8x32xf32, #tpu.memory_space<vmem>>, vector<8x32xf32>,
    } else {
    }
    %c0 = arith.constant 0 : index
    %c0_1 = arith.constant 0 : index
    %3 = vector.load %arg8[%c0, %c0_1] : memref<8x32xf32, #tpu.memory_space<vmem>>, vector<8x32xf32>
    %c0_2 = arith.constant 0 : index
    %c0_3 = arith.constant 0 : index
    %c0_4 = arith.constant 0 : index
    %c0_5 = arith.constant 0 : index
    %4 = vector.load %arg5[%c0_2, %c0_3, %c0_4, %c0_5] : memref<1x1x32x8xf32, #tpu.memory_space<vmem>>, vector<1x1x32x8xf32>
    %5 = vector.shape_cast %4 : vector<1x1x32x8xf32> to vector<32x8xf32>
    %cst = arith.constant dense<0.000000e+00> : vector<8x8xf32>
    %6 = tpu.matmul %3, %5, %cst {dimension_numbers = #tpu.dot_dimension_numbers<[1], [0], [0], [1], [0, 0, 1, 1], [], []>} : vector<8x32xf32>, vector<32x8xf32>, vector<8x8xf32> -> vector<8x8xf32>
    %c0_6 = arith.constant 0 : index
    %c0_7 = arith.constant 0 : index
    %7 = vector.load %arg9[%c0_6, %c0_7] : memref<8x1xf32, #tpu.memory_space<vmem>>, vector<8x1xf32>
    %cst_8 = arith.constant dense<0xFF800000> : vector<8xf32>
    %8 = vector.multi_reduction <maximumf>, %6, %cst_8 [1] : vector<8x8xf32> to vector<8xf32>
    %9 = vector.shape_cast %8 : vector<8xf32> to vector<8x1xf32>
    %10 = arith.maximumf %7, %9 : vector<8x1xf32>
    %11 = arith.subf %7, %10 : vector<8x1xf32>
    %12 = math.exp %11 : vector<8x1xf32>
    %13 = vector.broadcast %10 : vector<8x1xf32> to vector<8x8xf32>
    %14 = arith.subf %6, %13 : vector<8x8xf32>
    %15 = math.exp %14 : vector<8x8xf32>
    %cst_9 = arith.constant dense<0.000000e+00> : vector<8xf32>
    %16 = vector.multi_reduction <add>, %15, %cst_9 [1] : vector<8x8xf32> to vector<8xf32>
    %17 = vector.shape_cast %16 : vector<8xf32> to vector<8x1xf32>
    %c0_10 = arith.constant 0 : index
    %c0_11 = arith.constant 0 : index
    %18 = vector.load %arg10[%c0_10, %c0_11] : memref<8x1xf32, #tpu.memory_space<vmem>>, vector<8x1xf32>
    %19 = arith.mulf %12, %18 : vector<8x1xf32>
    %20 = arith.addf %19, %17 : vector<8x1xf32>
    %c0_12 = arith.constant 0 : index
    %c0_13 = arith.constant 0 : index
    %21 = vector.load %arg10[%c0_12, %c0_13] : memref<8x1xf32, #tpu.memory_space<vmem>>, vector<8x1xf32>
    tpu.vector_store %arg10[%c0_12, %c0_13], %20 {strides = array<i32>} : memref<8x1xf32, #tpu.memory_space<vmem>>, vector<8x1xf32>,
    %c0_14 = arith.constant 0 : index
    %c0_15 = arith.constant 0 : index
    %22 = vector.load %arg11[%c0_14, %c0_15] : memref<8x32xf32, #tpu.memory_space<vmem>>, vector<8x32xf32>
    %23 = vector.broadcast %12 : vector<8x1xf32> to vector<8x32xf32>
    %24 = arith.mulf %23, %22 : vector<8x32xf32>
    %c0_16 = arith.constant 0 : index
    %c0_17 = arith.constant 0 : index
    %c0_18 = arith.constant 0 : index
    %c0_19 = arith.constant 0 : index
    %25 = vector.load %arg6[%c0_16, %c0_17, %c0_18, %c0_19] : memref<1x1x8x32xf32, #tpu.memory_space<vmem>>, vector<1x1x8x32xf32>
    %26 = vector.shape_cast %25 : vector<1x1x8x32xf32> to vector<8x32xf32>
    %cst_20 = arith.constant dense<0.000000e+00> : vector<8x32xf32>
    %27 = tpu.matmul %15, %26, %cst_20 {dimension_numbers = #tpu.dot_dimension_numbers<[1], [0], [0], [1], [0, 0, 1, 1], [], []>} : vector<8x8xf32>, vector<8x32xf32>, vector<8x32xf32> -> vector<8x32xf32>
    %28 = arith.addf %24, %27 : vector<8x32xf32>
    %c0_21 = arith.constant 0 : index
    %c0_22 = arith.constant 0 : index
    %29 = vector.load %arg11[%c0_21, %c0_22] : memref<8x32xf32, #tpu.memory_space<vmem>>, vector<8x32xf32>
    tpu.vector_store %arg11[%c0_21, %c0_22], %28 {strides = array<i32>} : memref<8x32xf32, #tpu.memory_space<vmem>>, vector<8x32xf32>,
    %c0_23 = arith.constant 0 : index
    %c0_24 = arith.constant 0 : index
    %30 = vector.load %arg9[%c0_23, %c0_24] : memref<8x1xf32, #tpu.memory_space<vmem>>, vector<8x1xf32>
    tpu.vector_store %arg9[%c0_23, %c0_24], %10 {strides = array<i32>} : memref<8x1xf32, #tpu.memory_space<vmem>>, vector<8x1xf32>,
    %c0_i32_25 = arith.constant 0 : i32
    %31 = arith.cmpi eq, %arg3, %c0_i32_25 : i32
    %32 = arith.extui %31 : i1 to i32
    %c0_i32_26 = arith.constant 0 : i32
    %33 = arith.cmpi ne, %32, %c0_i32_26 : i32
    scf.if %33 {
      %c0_27 = arith.constant 0 : index
      %c0_28 = arith.constant 0 : index
      %34 = vector.load %arg10[%c0_27, %c0_28] : memref<8x1xf32, #tpu.memory_space<vmem>>, vector<8x1xf32>
      %35 = tpu.reciprocal %34 : vector<8x1xf32> -> vector<8x1xf32>
      %c0_29 = arith.constant 0 : index
      %c0_30 = arith.constant 0 : index
      %36 = vector.load %arg11[%c0_29, %c0_30] : memref<8x32xf32, #tpu.memory_space<vmem>>, vector<8x32xf32>
      %37 = vector.broadcast %35 : vector<8x1xf32> to vector<8x32xf32>
      %38 = arith.mulf %36, %37 : vector<8x32xf32>
      %c0_31 = arith.constant 0 : index
      %c0_32 = arith.constant 0 : index
      %c0_33 = arith.constant 0 : index
      %c0_34 = arith.constant 0 : index
      %39 = vector.load %arg7[%c0_31, %c0_32, %c0_33, %c0_34] : memref<1x1x8x32xf32, #tpu.memory_space<vmem>>, vector<1x1x8x32xf32>
      %40 = vector.shape_cast %39 : vector<1x1x8x32xf32> to vector<8x32xf32>
      %41 = vector.shape_cast %38 : vector<8x32xf32> to vector<1x1x8x32xf32>
      tpu.vector_store %arg7[%c0_31, %c0_32, %c0_33, %c0_34], %41 {strides = array<i32>} : memref<1x1x8x32xf32, #tpu.memory_space<vmem>>, vector<1x1x8x32xf32>,
    } else {
    }
    return
  }
  func.func @transform_0(%arg0: i32, %arg1: i32, %arg2: i32, %arg3: i32) -> (i32, i32, i32, i32) {
    %c0_i32 = arith.constant 0 : i32
    %c0_i32_0 = arith.constant 0 : i32
    return %arg0, %arg1, %arg2, %c0_i32 : i32, i32, i32, i32
  }
  func.func @transform_1(%arg0: i32, %arg1: i32, %arg2: i32, %arg3: i32) -> (i32, i32, i32, i32) {
    %c0_i32 = arith.constant 0 : i32
    %c0_i32_0 = arith.constant 0 : i32
    return %arg0, %arg1, %c0_i32, %arg3 : i32, i32, i32, i32
  }
  func.func @transform_2(%arg0: i32, %arg1: i32, %arg2: i32, %arg3: i32) -> (i32, i32, i32, i32) {
    %c0_i32 = arith.constant 0 : i32
    %c0_i32_0 = arith.constant 0 : i32
    return %arg0, %arg1, %arg3, %c0_i32 : i32, i32, i32, i32
  }
  func.func @transform_3(%arg0: i32, %arg1: i32, %arg2: i32, %arg3: i32) -> (i32, i32, i32, i32) {
    %c0_i32 = arith.constant 0 : i32
    %c0_i32_0 = arith.constant 0 : i32
    return %arg0, %arg1, %arg2, %c0_i32 : i32, i32, i32, i32
  }
}

</mosaic_0001>

<bundles_post_ra>
// kernel: tpu_custom_call.1
= control target key start
LH: loop header
LB: loop body
LE: loop exit
PB: predicated region body
PF: predicated region fallthrough
CT: control target
= control target key end

     0   :  { %8 = vsyncpa [#allocation7], 0  ;;  %s1065_s0 = inlined_call_operand.vmem [shape: f32[2,4,8,32], index: 0, kind: input, shape index: {}]   ;;  %s1066_s1 = inlined_call_operand.vmem [shape: f32[2,4,32,8], index: 1, kind: input, shape index: {}]   ;;  %s1067_s2 = inlined_call_operand.vmem [shape: f32[2,4,8,32], index: 2, kind: input, shape index: {}]   ;;  %s1068_s3 = inlined_call_operand.hbm [shape: f32[2,4,8,32], index: 3, kind: output, shape index: {}]  }
   0x1   :  { %10 = vsyncpa [#allocation7 + $0x1], 0  ;;  %s916_s12 = smov 0   ;;  %s918_s13 = smov 0  }
   0x2   :  { %s920_s14 = smov 0   ;;  %s922_s15 = smov 0  }
   0x3   :  { %s924_s16 = smov 0   ;;  %s926_s17 = smov 0  }
   0x4   :  { %s928_s18 = smov 0   ;;  %s930_s19 = smov 0  }
   0x5 LB: > { %s671_s20 = sadd.s32 4294967295, %s889_s19   ;;  %s672_s21 = sadd.s32 4294967294, %s889_s19   ;;  %s889_s19 = sphi %s930_s19, %s16_s19   ;;  %s885_s18 = sphi %s928_s18, %s1080_s18   ;;  %s881_s17 = sphi %s926_s17, %s1079_s17   ;;  %s877_s16 = sphi %s924_s16, %s1078_s16   ;;  %s873_s15 = sphi %s922_s15, %s1077_s15   ;;  %s869_s14 = sphi %s920_s14, %s1076_s14   ;;  %s865_s13 = sphi %s918_s13, %s1075_s13   ;;  %s861_s12 = sphi %s916_s12, %s1074_s12  }
   0x6   : > { %s38_s22 = sadd.s32 1, %s881_s17  ;;  %s42_s23 = sadd.s32 1, %s885_s18 }
   0x7   : > { %p40_p0 = scmp.ge.s32.totalorder %s38_s22, 4  ;;  %p153_p1 = scmp.ne.s32.totalorder %s869_s14, %s865_s13 }
   0x8   : > { %p154_p2 = scmp.eq.s32.totalorder %s671_s20, 7  ;;  %p159_p5 = scmp.ne.s32.totalorder %s865_s13, %s861_s12 }
   0x9   : > { %s1082_s22 = smov (%p40_p0, %s38_s22), 0  ;;  %s1084_s23 = smov (!%p40_p0, %s42_s23), %s885_s18 }
   0xa   : > { %s137_s24 = ssub.s32 %s881_s17, %s1082_s22  ;;  %p967_p3 = por %p154_p2, %p153_p1 }
   0xb   : > { %p44_p4 = scmp.ge.s32.totalorder %s1084_s23, 2  ;;  %p160_p6 = scmp.eq.s32.totalorder %s672_s21, 7 }
   0xc   : > { %p675_p7 = scmp.ge.s32.totalorder %s889_s19, 1  ;;  %p221_p9 = scmp.lt.s32.totalorder %s889_s19, 9 }
   0xd   : > { %s1086_s23 = smov (%p44_p4, %s1084_s23), 0  ;;  %p976_p8 = por %p160_p6, %p159_p5 }
   0xe   : > { %1071 = sst [smem:[#allocation9_spill]] %s1086_s23  ;;  %s136_s27 = ssub.s32 %s885_s18, %s1086_s23 }
   0xf   : > { %s143_s28 = sadd.s32 1, %s869_s14  ;;  %s138_s29 = sor.u32 %s137_s24, %s136_s27 }
  0x10   : > { %p222_p10 = pnand %p675_p7, %p221_p9  ;;  %p141_p11 = scmp.eq.s32.totalorder %s138_s29, 0 }
  0x11   : > { %p274_p12 = scmp.lt.s32.totalorder (!%p222_p10), %s877_s16, 1  ;;  %p276_p13 = scmp.lt.s32.totalorder (!%p222_p10), %s873_s15, 3 }
  0x12   : > { %s985_s30 = scalar_select %p141_p11, %s869_s14, %s143_s28  }
  0x13   : > { %225 = sbr.rel (%p222_p10) target bundleno = 819 (0x333), region = 32 }
  0x18   : > { %vm314_vm0 = vcmask 261120   ;;  %v891_v0 = vmov 0.0   ;;  %vm892_vm1 = vmmov 0   ;;  %s275_s4 = scalar_select %p274_p12, %s877_s16, 1  ;;  %vm316_vm2 = vcmask 7168  }
  0x19   : > { %698 = vmatprep.subr.mxu0 %v891_v0  ;;  %706 = vmatprep.mubr.msk.f32.mxu0 %vm892_vm1, %v891_v0  ;;  %319 = vst.msk [vmem:[#allocation5] sm:$0xff] %vm314_vm0, %v891_v0  ;;  %s277_s5 = scalar_select %p276_p13, %s873_s15, 3  ;;  %v893_v8 = vmov -inf   ;;  %vm400_vm3 = vcmask 64512   ;;  %v894_v12 = vmov 0  }
  0x1a   : > { %709 = vmatprep.subr.mxu1 %v891_v0  ;;  %711 = vmatprep.mubr.msk.f32.mxu1 %vm892_vm1, %v891_v0  ;;  %s677_s6 = sshll.u32 %s275_s4, 2  ;;  %s680_s7 = sshll.u32 %s275_s4, 4  ;;  %317 = vst.msk [vmem:[#allocation3] sm:$0xff] %vm316_vm2, %v893_v8  ;;  %318 = vst.msk [vmem:[#allocation4] sm:$0xff] %vm316_vm2, %v891_v0 }
  0x1b   : > { %s992_s8 = sadd.s32 %s677_s6, %s277_s5  ;;  %s679_s9 = sshll.u32 %s277_s5, 2  ;;  %789 = vset.pattern.permute.xlu0 %v894_v12  ;;  %790 = vset.pattern.permute.xlu1 %v894_v12 }
  0x1c   : > { %s678_s10 = sshll.u32 %s992_s8, 3  ;;  %s294_s11 = sadd.s32 %s680_s7, %s679_s9 }
  0x1d   : > { %s284_s24 = scalar_lea.vmem %s1065_s0, %s678_s10  ;;  %s681_s27 = sshll.u32 %s294_s11, 3 }
  0x1e   : > { %s296_s23 = scalar_lea.vmem %s1066_s1, %s681_s27  ;;  %v312_v1 = vld [vmem:[%s284_s24] sm:$0xff]  ;;  %s307_s5 = scalar_lea.vmem %s1067_s2, %s678_s10 }
  0x1f   : > { %v313_v2 = vmul.f32 0.17677669, %v312_v1  ;;  %v324_v3 = vld [vmem:[%s296_s23 + $0x18] sm:$0xff]  ;;  %v323_v4 = vld [vmem:[%s296_s23 + $0x10] sm:$0xff]  ;;  %v322_v5 = vld [vmem:[%s296_s23 + $0x8] sm:$0xff]  ;;  %s271_s6 = sand.u32 1, %s865_s13  }
  0x20   : > { %699 = vmatpush3.msra.mxu0 %v324_v3  ;;  %v321_v6 = vld [vmem:[%s296_s23] sm:$0xff]  ;;  %v424_v31 = vld [vmem:[#allocation5] sm:$0xff]  ;;  %s676_s7 = sshll.u32 %s271_s6, 3  ;;  %s687_s8 = sshll.u32 %s877_s16, 2 }
  0x21   : > { %700 = vmatprep.subr.mxu0 %v891_v0  ;;  %315 = vst.msk [vmem:[#allocation2] sm:$0xff] %vm314_vm0, %v313_v2  ;;  %v399_v13 = vld [vmem:[#allocation3] sm:$0xff]  ;;  %v431_v17 = vld [vmem:[%s307_s5] sm:$0xff]  ;;  %v419_v25 = vld [vmem:[#allocation4] sm:$0xff]  ;;  %s534_s9 = sadd.s32 %s873_s15, %s687_s8  ;;  %s273_s11 = scalar_lea.vmem [#allocation6], %s676_s7 }
  0x22   : > { %701 = vmatpush3.msra.mxu0 %v323_v4  ;;  %710 = vmatpush3.msra.mxu1 %v431_v17  ;;  %s688_s10 = sshll.u32 %s534_s9, 7  ;;  %s538_s20 = sshll.u32 %s273_s11, 4  ;;  %s539_s20 = int_to_ptr.vmem [resolvable:$true] %s538_s20 }
  0x23   : > { %702 = vmatprep.subr.mxu0 %v891_v0  ;;  %s536_s27 = scalar_lea.hbm %s1068_s3, %s688_s10  ;;  %s522_s28 = scalar_lea.sflag [#allocation7], %s271_s6 }
  0x24   : > { %703 = vmatpush3.msra.mxu0 %v322_v5  ;;  %s797_s29 = scalar_lea.vmem %s539_s20, 128  ;;  %s895_s15 = smov [#allocation6]  }
  0x25   : > { %704 = vmatprep.subr.mxu0 %v891_v0  ;;  %p798_p0 = scmp.ne.s32.totalorder %s539_s20, %s797_s29  ;;  %s801_s16 = sshll.u32 %s895_s15, 4  ;;  %s802_s16 = int_to_ptr.vmem [resolvable:$false] %s801_s16 }
  0x26   : > { %705 = vmatpush3.msra.mxu0 %v321_v6  ;;  %s803_s23 = scalar_lea.vmem %s802_s16, 256  ;;  %p804_p4 = scmp.lt.s32.totalorder %s539_s20, %s802_s16 }
  0x27   : > { %p799_p1 = pnand %p798_p0, %p967_p3  ;;  %p805_p5 = scmp.lt.s32.totalorder %s803_s23, %s797_s29 }
  0x28   : > { %v320_v7 = vld [vmem:[#allocation2] sm:$0xff] }
  0x29   : > { %707 = vmatmul.mubr.msk.f32.vlgmr.msra.gmra.mxu0 %vm314_vm0, %v320_v7  ;;  %p800_p2 = pneg %p799_p1  ;;  %p806_p6 = por %p805_p5, %p804_p4 }
  0x2b   : > { %p807_p7 = pnand %p806_p6, %p800_p2 }
  0xe9   : > { %v395_v9 = vpop.f32.mrf.mxu0 }
  0xea   : > { %v401_v10 = vsel %vm400_vm3, %v395_v9, -inf }
  0xeb   : > { %402 = vmax.xlane.f32.xlu0 %v401_v10  ;;  %v708_v11 = vpop.f32.mrf.mxu0 }
 0x174   : > { %v403_v14 = vpop.xlane.xlu0 %402 }
 0x175   : > { %v404_v15 = vmax.f32 %v399_v13, %v403_v14 }
 0x177   : > { %v405_v16 = vsub.f32 %v399_v13, %v404_v15  ;;  %507 = vst.msk [vmem:[#allocation3] sm:$0xff] %vm316_vm2, %v404_v15  ;;  %410 = vperm.xlu0 %789, %v404_v15  }
 0x179   : > { %v406_v22 = vmul.f32 1.442695, %v405_v16 }
 0x1f2   : > { %v411_v18 = vpop.permute.xlu0 %410 }
 0x1f3   : > { %v413_v19 = vsub.f32 %v395_v9, %v411_v18 }
 0x1f5   : > { %v414_v20 = vmul.f32 1.442695, %v413_v19 }
 0x1f7   : > { %791 = vpow2.f32 %v414_v20 }
 0x1f8   : > { %793 = vpow2.f32 %v406_v22 }
 0x204   : > { %v792_v21 = vpop.eup %791 }
 0x205   : > { %712 = vmatmul.mubr.msk.f32.vlgmr.msra.gmra.mxu1 %vm400_vm3, %v792_v21  ;;  %v416_v23 = vsel %vm400_vm3, %v792_v21, 0.0  ;;  %v794_v24 = vpop.eup %793 }
 0x206   : > { %417 = vadd.xlane.f32.xlu1 %v416_v23  ;;  %v420_v26 = vmul.f32 %v794_v24, %v419_v25 }
 0x217   : > { %427 = vperm.xlu1 %790, %v794_v24  }
 0x28f   : > { %v418_v27 = vpop.xlane.xlu1 %417 }
 0x290   : > { %v421_v28 = vadd.f32 %v420_v26, %v418_v27 }
 0x292   : > { %423 = vst.msk [vmem:[#allocation4] sm:$0xff] %vm316_vm2, %v421_v28 }
 0x293   : > { %v428_v32 = vpop.permute.xlu1 %427 }
 0x294   : > { %v430_v33 = vmul.f32 %v428_v32, %v424_v31 }
 0x299   : > { %v511_v29 = vld [vmem:[#allocation4] sm:$0xff] }
 0x29a   : > { %795 = vrcp.f32 %v511_v29 }
 0x2a7   : > { %v796_v30 = vpop.eup %795 }
 0x2a8   : > { %516 = vperm.xlu1 %790, %v796_v30  }
 0x2c5   : > { %v501_v34 = vpop.f32.mrf.mxu1 }
 0x2c6   : > { %v505_v35 = vadd.f32 %v501_v34, %v430_v33 }
 0x2c7   : > { %v713_v36 = vpop.f32.mrf.mxu1 }
 0x2c8   : > { %506 = vst.msk [vmem:[#allocation5] sm:$0xff] %vm314_vm0, %v505_v35 }
 0x2cf   : > { %v513_v37 = vld [vmem:[#allocation5] sm:$0xff] }
 0x323   : > { %v517_v38 = vpop.permute.xlu1 %516 }
 0x324   : > { %v519_v39 = vmul.f32 %v517_v38, %v513_v37 }
 0x326   : > { %520 = vst.msk [vmem:[%s273_s11] sm:$0xff] %vm314_vm0, %v519_v39 }
 0x327   : > { %810 = shalt.err (!%p807_p7)
}
 0x328   : > { %s811_s4 = scalar_lea.hbm %s536_s27, 128  ;;  %s815_s7 = scalar_lea.hbm %s1068_s3, 1024 }
 0x329   : > { %p812_p9 = scmp.ne.s32.totalorder %s536_s27, %s811_s4  ;;  %p816_p12 = scmp.lt.s32.totalorder %s536_s27, %s1068_s3 }
 0x32a   : > { %p817_p13 = scmp.lt.s32.totalorder %s815_s7, %s811_s4 }
 0x32b   : > { %p813_p10 = pnand %p812_p9, %p967_p3 }
 0x32c   : > { %p818_p0 = por %p817_p13, %p816_p12 }
 0x32d   : > { %p814_p11 = pneg %p813_p10 }
 0x32f   : > { %p819_p1 = pnand %p818_p0, %p814_p11 }
 0x331   : > { %822 = shalt.err (!%p819_p1)
}
 0x332   : > { %714 = dma.vmem_to_hbm [thread:$0]  (%p967_p3), %s539_s20, 128, %s536_s27, %s522_s28  }
 0x333 PF: > { %p720_p2 = scmp.ge.s32.totalorder %s889_s19, 2  ;;  %s550_s10 = sand.u32 1, %s861_s12  }
 0x334   : > { %s551_s11 = scalar_lea.sflag [#allocation7], %s550_s10 }
 0x335   : > { %p717_p4 = pnand %p720_p2, %p976_p8 }
 0x337   : > { %p718_p5 = pneg %p717_p4 }
 0x339   : > { %856 = dma.done.wait (%p718_p5), %s551_s11, 128  }
 0x33a   : > { %858 = vsyncadd (%p718_p5), %s551_s11, 4294967168  ;;  %s16_s19 = sadd.s32 1, %s889_s19   ;;  %s1073_s25 = sld [smem:[#allocation9_spill]] }
 0x33b   : > { %p13_p6 = scmp.ge.s32.totalorder %s16_s19, 10   ;;  %s1074_s12 = smov %s865_s13 }
 0x33c   : > { %s1075_s13 = smov %s869_s14  ;;  %s1076_s14 = smov %s985_s30 }
 0x33d   : > { %s1077_s15 = smov %s881_s17  ;;  %s1078_s16 = smov %s885_s18 }
 0x33e   : > { %s1079_s17 = smov %s1082_s22  ;;  %15 = sbr.rel (!%p13_p6) target bundleno = 5 (0x5), region = 81 }
 0x340   : > { %s1080_s18 = smov %s1073_s25 }
 0x343   :  { %556 = vsyncpa [#allocation7], 1 }
 0x344   :  { %558 = vsyncpa [#allocation7 + $0x1], 1 }

</bundles_post_ra>
